<compile_context>
chip_gen: v6e
topology: v6e:2x2x1
jax: 0.10.0
libtpu: 0.0.40
codegen_flags: <defaults>
</compile_context>

<pallas_src>
import functools

import jax
import jax.numpy as jnp
from jax.experimental import pallas as pl
from jax.experimental.pallas import tpu as pltpu


# ----------------------------------------------------------------------------
# Hardware-aware budgets
# ----------------------------------------------------------------------------
def _vmem_capacity_bytes():
    try:
        cap = int(pltpu.get_tpu_info().vmem_capacity_bytes)
        if cap > 0:
            return cap
    except Exception:
        pass
    return 64 << 20  # conservative (v7x-sized) fallback


def _budgets():
    cap = _vmem_capacity_bytes()
    vmem_limit = min(cap // 2, 64 << 20)            # v5e/v6e: 64 MiB, v7x: 32 MiB
    block_budget = (8 << 20) if cap >= (128 << 20) else (4 << 20)
    fused_budget = vmem_limit // 6                  # room for x + o double-buffered
    return vmem_limit, block_budget, fused_budget


# ----------------------------------------------------------------------------
# Tiling helpers
# ----------------------------------------------------------------------------
def _divisor_tiles(n, step):
    """[n] followed by divisors of n that are multiples of `step`, descending."""
    cands = [n]
    d = (n // step) * step
    while d >= step:
        if d != n and n % d == 0:
            cands.append(d)
        d -= step
    return cands


def _choose_tiles(B, C, S_pad, block_budget, dtype_bytes):
    """Pick (channel_tile, spatial_tile) so a (B, Ct, Ts) block fits the budget,
    preferring spatial tiles >= 512 lanes (long contiguous DMA runs)."""
    s_target = min(512, S_pad)
    best = None
    for ct in _divisor_tiles(C, 8):                  # C first, then multiples of 8
        fit = None
        for ts in _divisor_tiles(S_pad, 128):        # descending -> first fit = largest
            if B * ct * ts * dtype_bytes <= block_budget:
                fit = ts
                break
        if fit is None:
            continue
        if best is None:
            best = (ct, fit)
        if fit >= s_target:                          # largest Ct that keeps Ts >= 512
            best = (ct, fit)
            break
    if best is None:                                 # pathological; smallest legal block
        best = (_divisor_tiles(C, 8)[-1], 128)
    return best


# ----------------------------------------------------------------------------
# Kernels
# ----------------------------------------------------------------------------
def _se_fused_kernel(inv_s, x_ref, w1_ref, w2_ref, o_ref, y_ref):
    """Whole-activation fast path: pool + fc1/ReLU/fc2/sigmoid + rescale."""
    x32 = x_ref[...].astype(jnp.float32)                        # (B, C, S)
    pooled = jnp.sum(x32, axis=-1) * inv_s                      # (B, C)
    h = jnp.maximum(
        jnp.dot(pooled, w1_ref[...], preferred_element_type=jnp.float32), 0.0)
    z = jnp.dot(h, w2_ref[...], preferred_element_type=jnp.float32)
    y = 1.0 / (1.0 + jnp.exp(-z))                               # exact sigmoid
    y_ref[...] = y
    o_ref[...] = x_ref[...] * y[:, :, None].astype(x_ref.dtype)


def _se_pool_kernel(x_ref, p_ref):
    """Partial pooled sums.  x_ref: (B, Ct, Ts); p_ref: (1, 1, B, Ct) f32 output
    block, resident across the last ("arbitrary") spatial grid axis."""
    s = pl.program_id(2)

    @pl.when(s == 0)
    def _():
        p_ref[...] = jnp.zeros_like(p_ref)

    p_ref[...] += jnp.sum(x_ref[...].astype(jnp.float32), axis=-1)[None, None]


def _se_excite_kernel(pooled_ref, w1_ref, w2_ref, y_ref):
    """fc1 -> ReLU -> fc2 -> exact sigmoid on the pooled (B, C) activations."""
    h = jnp.maximum(
        jnp.dot(pooled_ref[...], w1_ref[...], preferred_element_type=jnp.float32),
        0.0)
    z = jnp.dot(h, w2_ref[...], preferred_element_type=jnp.float32)
    y_ref[...] = 1.0 / (1.0 + jnp.exp(-z))


def _se_scale_kernel(x_ref, y_ref, o_ref):
    """o = x * y.  x/o: (B, Ct, Ts); y: (B, Ct, 1) -> pure lane-broadcast VPU."""
    o_ref[...] = x_ref[...] * y_ref[...].astype(x_ref.dtype)


# ----------------------------------------------------------------------------
# Wrapper
# ----------------------------------------------------------------------------
def se_layer(x_nchw, w1, w2, *, fused_budget_bytes=None, block_budget_bytes=None):
    """SELayer.forward.

    x_nchw: (B, C, H, W)   w1: (C, C//r)   w2: (C//r, C)   (weights stored (in, out))
    Returns (x * y, y) with y shaped (B, C, 1, 1), matching the PyTorch module.
    """
    B, C, H, W = x_nchw.shape
    S = H * W
    dtype_bytes = jnp.dtype(x_nchw.dtype).itemsize
    vmem_limit, block_budget, fused_budget = _budgets()
    if block_budget_bytes is not None:
        block_budget = block_budget_bytes
    if fused_budget_bytes is not None:
        fused_budget = fused_budget_bytes

    x = x_nchw.reshape(B, C, S)
    act_bytes = B * C * S * dtype_bytes

    # ---------------- fused single-pass fast path ----------------
    if act_bytes <= fused_budget:
        cost = pl.CostEstimate(flops=3 * B * C * S,
                               transcendentals=B * C,
                               bytes_accessed=2 * act_bytes)
        xs, y = pl.pallas_call(
            functools.partial(_se_fused_kernel, 1.0 / float(S)),
            out_shape=(jax.ShapeDtypeStruct((B, C, S), x.dtype),
                       jax.ShapeDtypeStruct((B, C), jnp.float32)),
            grid=(1,),
            in_specs=[
                pl.BlockSpec((B, C, S), lambda i: (0, 0, 0)),
                pl.BlockSpec(w1.shape, lambda i: (0, 0)),
                pl.BlockSpec(w2.shape, lambda i: (0, 0)),
            ],
            out_specs=(pl.BlockSpec((B, C, S), lambda i: (0, 0, 0)),
                       pl.BlockSpec((B, C), lambda i: (0, 0))),
            compiler_params=pltpu.CompilerParams(
                dimension_semantics=("arbitrary",),
                vmem_limit_bytes=vmem_limit),
            cost_estimate=cost,
        )(x, w1, w2)
        return xs.reshape(B, C, H, W), y.reshape(B, C, 1, 1)

    # ---------------- general tiled path ----------------
    # Pad S up to a multiple of 128 (zeros do not perturb the pooled sum).
    S_pad = ((S + 127) // 128) * 128
    x_p = x if S_pad == S else jnp.pad(x, ((0, 0), (0, 0), (0, S_pad - S)))

    ct, ts = _choose_tiles(B, C, S_pad, block_budget, dtype_bytes)
    nc = C // ct                                   # channel blocks
    nb = S_pad // ts                               # total spatial blocks
    nsplit = 2 if (nb >= 2 and nb % 2 == 0) else 1  # shard pass 1 over 2 TCs (v7x)
    ns = nb // nsplit

    # --- pass 1a: tiled partial pooled sums --------------------------------
    pool_cost = pl.CostEstimate(flops=B * C * S_pad, transcendentals=0,
                                bytes_accessed=B * C * S_pad * dtype_bytes)
    parts = pl.pallas_call(
        _se_pool_kernel,
        out_shape=jax.ShapeDtypeStruct((nsplit, nc, B, ct), jnp.float32),
        grid=(nsplit, nc, ns),
        in_specs=[pl.BlockSpec((B, ct, ts), lambda p, c, s: (0, c, p * ns + s))],
        out_specs=pl.BlockSpec((1, 1, B, ct), lambda p, c, s: (p, c, 0, 0)),
        compiler_params=pltpu.CompilerParams(
            dimension_semantics=("parallel", "parallel", "arbitrary"),
            vmem_limit_bytes=vmem_limit),
        cost_estimate=pool_cost,
    )(x_p)

    # Tiny combine of the per-split / per-channel-block partials (a few KiB).
    pooled = (jnp.sum(parts, axis=0).transpose(1, 0, 2).reshape(B, C)
              * (1.0 / float(S)))

    # --- pass 1b: excite (fc1 -> ReLU -> fc2 -> sigmoid), one-off -----------
    y = pl.pallas_call(
        _se_excite_kernel,
        out_shape=jax.ShapeDtypeStruct((B, C), jnp.float32),
        grid=(1,),
        in_specs=[
            pl.BlockSpec((B, C), lambda i: (0, 0)),
            pl.BlockSpec(w1.shape, lambda i: (0, 0)),
            pl.BlockSpec(w2.shape, lambda i: (0, 0)),
        ],
        out_specs=pl.BlockSpec((B, C), lambda i: (0, 0)),
        compiler_params=pltpu.CompilerParams(
            dimension_semantics=("arbitrary",),
            vmem_limit_bytes=vmem_limit),
    )(pooled, w1, w2)

    # --- pass 2: o = x * y, streaming, megacore-parallel --------------------
    y3 = y.reshape(B, C, 1)                        # C on sublanes in the block
    scale_cost = pl.CostEstimate(flops=B * C * S_pad, transcendentals=0,
                                 bytes_accessed=2 * B * C * S_pad * dtype_bytes)
    xs_p = pl.pallas_call(
        _se_scale_kernel,
        out_shape=jax.ShapeDtypeStruct((B, C, S_pad), x.dtype),
        grid=(nc, nb),
        in_specs=[
            pl.BlockSpec((B, ct, ts), lambda c, s: (0, c, s)),
            pl.BlockSpec((B, ct, 1), lambda c, s: (0, c, 0)),
        ],
        out_specs=pl.BlockSpec((B, ct, ts), lambda c, s: (0, c, s)),
        compiler_params=pltpu.CompilerParams(
            dimension_semantics=("parallel", "parallel"),
            vmem_limit_bytes=vmem_limit),
        cost_estimate=scale_cost,
    )(x_p, y3)

    xs = xs_p[:, :, :S] if S_pad != S else xs_p
    return xs.reshape(B, C, H, W), y.reshape(B, C, 1, 1)


# ----------------------------------------------------------------------------
# Deterministic params (shapes from SELayer.__init__: Linear layers, no bias)
# ----------------------------------------------------------------------------
def init_params(key, channel, reduction=16):
    cr = max(channel // reduction, 1)
    k1, k2 = jax.random.split(key)
    w1 = jax.random.normal(k1, (channel, cr), jnp.float32) / jnp.sqrt(float(channel))
    w2 = jax.random.normal(k2, (cr, channel), jnp.float32) / jnp.sqrt(float(cr))
    return w1, w2


def _reference(x, w1, w2):
    pooled = jnp.mean(x, axis=(2, 3))
    y = jax.nn.sigmoid(jnp.maximum(pooled @ w1, 0.0) @ w2)
    return x * y[:, :, None, None], y[:, :, None, None]


if __name__ == "__main__":
    key = jax.random.PRNGKey(0)
    k_x, k_p, k_x2, k_x3 = jax.random.split(key, 4)

    B, C = 2, 64
    w1, w2 = init_params(k_p, channel=C, reduction=16)

    # 1) Fused fast path (default for small activations).
    x = jax.random.normal(k_x, (B, C, 16, 16), jnp.float32)
    xs, y = jax.jit(lambda a: se_layer(a, w1, w2))(x)
    jax.block_until_ready((xs, y))
    xs_ref, y_ref = _reference(x, w1, w2)
    assert xs.shape == (B, C, 16, 16) and y.shape == (B, C, 1, 1)
    assert jnp.allclose(y, y_ref, atol=1e-3, rtol=1e-3)
    assert jnp.allclose(xs, xs_ref, atol=1e-3, rtol=1e-3)

    # 2) General tiled path (forced), small block budget so the grid has
    #    channel blocks, multiple spatial tiles, and the 2-way pass-1 split.
    x2 = jax.random.normal(k_x2, (B, C, 32, 32), jnp.float32)
    xs2, y2 = jax.jit(lambda a: se_layer(
        a, w1, w2, fused_budget_bytes=0, block_budget_bytes=8192))(x2)
    jax.block_until_ready((xs2, y2))
    xs2_ref, y2_ref = _reference(x2, w1, w2)
    assert jnp.allclose(y2, y2_ref, atol=1e-3, rtol=1e-3)
    assert jnp.allclose(xs2, xs2_ref, atol=1e-3, rtol=1e-3)

    # 3) Tiled path with spatial extent not divisible by 128 (pads 100 -> 128).
    x3 = jax.random.normal(k_x3, (B, C, 10, 10), jnp.float32)
    xs3, y3 = jax.jit(lambda a: se_layer(a, w1, w2, fused_budget_bytes=0))(x3)
    jax.block_until_ready((xs3, y3))
    xs3_ref, y3_ref = _reference(x3, w1, w2)
    assert jnp.allclose(y3, y3_ref, atol=1e-3, rtol=1e-3)
    assert jnp.allclose(xs3, xs3_ref, atol=1e-3, rtol=1e-3)

    print("KERNEL_OK")
</pallas_src>

<mosaic_0001>
module attributes {stable_mosaic.version = 11 : i64} {
  func.func @_se_fused_kernel(%arg0: i32, %arg1: memref<2x64x256xf32, #tpu.memory_space<vmem>>, %arg2: memref<64x4xf32, #tpu.memory_space<vmem>>, %arg3: memref<4x64xf32, #tpu.memory_space<vmem>>, %arg4: memref<2x64x256xf32, #tpu.memory_space<vmem>>, %arg5: memref<2x64xf32, #tpu.memory_space<vmem>>) attributes {dimension_semantics = [#tpu.dimension_semantics<arbitrary>], iteration_bounds = array<i64: 1>, scalar_prefetch = 0 : i64, scratch_operands = 0 : i64, tpu.core_type = #tpu.core_type<tc>, window_params = [{pipeline_mode = #tpu.pipeline_mode<synchronous>, transform_indices = @transform_0, window_bounds = array<i64: 2, 64, 256>}, {pipeline_mode = #tpu.pipeline_mode<synchronous>, transform_indices = @transform_1, window_bounds = array<i64: 64, 4>}, {pipeline_mode = #tpu.pipeline_mode<synchronous>, transform_indices = @transform_2, window_bounds = array<i64: 4, 64>}, {pipeline_mode = #tpu.pipeline_mode<synchronous>, transform_indices = @transform_3, window_bounds = array<i64: 2, 64, 256>}, {pipeline_mode = #tpu.pipeline_mode<synchronous>, transform_indices = @transform_4, window_bounds = array<i64: 2, 64>}]} {
    %c0 = arith.constant 0 : index
    %c0_0 = arith.constant 0 : index
    %c0_1 = arith.constant 0 : index
    %0 = vector.load %arg1[%c0, %c0_0, %c0_1] : memref<2x64x256xf32, #tpu.memory_space<vmem>>, vector<2x64x256xf32>
    %cst = arith.constant dense<0.000000e+00> : vector<2x64xf32>
    %1 = vector.multi_reduction <add>, %0, %cst [2] : vector<2x64x256xf32> to vector<2x64xf32>
    %cst_2 = arith.constant 3.906250e-03 : f32
    %2 = vector.broadcast %cst_2 : f32 to vector<2x64xf32>
    %3 = arith.mulf %1, %2 : vector<2x64xf32>
    %c0_3 = arith.constant 0 : index
    %c0_4 = arith.constant 0 : index
    %4 = vector.load %arg2[%c0_3, %c0_4] : memref<64x4xf32, #tpu.memory_space<vmem>>, vector<64x4xf32>
    %cst_5 = arith.constant dense<0.000000e+00> : vector<2x4xf32>
    %5 = tpu.matmul %3, %4, %cst_5 {dimension_numbers = #tpu.dot_dimension_numbers<[1], [0], [0], [1], [0, 0, 1, 1], [], []>} : vector<2x64xf32>, vector<64x4xf32>, vector<2x4xf32> -> vector<2x4xf32>
    %cst_6 = arith.constant 0.000000e+00 : f32
    %6 = vector.broadcast %cst_6 : f32 to vector<2x4xf32>
    %7 = arith.maximumf %5, %6 : vector<2x4xf32>
    %c0_7 = arith.constant 0 : index
    %c0_8 = arith.constant 0 : index
    %8 = vector.load %arg3[%c0_7, %c0_8] : memref<4x64xf32, #tpu.memory_space<vmem>>, vector<4x64xf32>
    %cst_9 = arith.constant dense<0.000000e+00> : vector<2x64xf32>
    %9 = tpu.matmul %7, %8, %cst_9 {dimension_numbers = #tpu.dot_dimension_numbers<[1], [0], [0], [1], [0, 0, 1, 1], [], []>} : vector<2x4xf32>, vector<4x64xf32>, vector<2x64xf32> -> vector<2x64xf32>
    %cst_10 = arith.constant 0.000000e+00 : f32
    %10 = vector.broadcast %cst_10 : f32 to vector<2x64xf32>
    %11 = arith.subf %10, %9 : vector<2x64xf32>
    %12 = math.exp %11 : vector<2x64xf32>
    %cst_11 = arith.constant 1.000000e+00 : f32
    %13 = vector.broadcast %cst_11 : f32 to vector<2x64xf32>
    %14 = arith.addf %13, %12 : vector<2x64xf32>
    %cst_12 = arith.constant 1.000000e+00 : f32
    %15 = vector.broadcast %cst_12 : f32 to vector<2x64xf32>
    %16 = arith.divf %15, %14 : vector<2x64xf32>
    %c0_13 = arith.constant 0 : index
    %c0_14 = arith.constant 0 : index
    %17 = vector.load %arg5[%c0_13, %c0_14] : memref<2x64xf32, #tpu.memory_space<vmem>>, vector<2x64xf32>
    tpu.vector_store %arg5[%c0_13, %c0_14], %16 {strides = array<i32>} : memref<2x64xf32, #tpu.memory_space<vmem>>, vector<2x64xf32>,
    %c0_15 = arith.constant 0 : index
    %c0_16 = arith.constant 0 : index
    %c0_17 = arith.constant 0 : index
    %18 = vector.load %arg1[%c0_15, %c0_16, %c0_17] : memref<2x64x256xf32, #tpu.memory_space<vmem>>, vector<2x64x256xf32>
    %19 = vector.shape_cast %16 : vector<2x64xf32> to vector<2x64x1xf32>
    %20 = vector.broadcast %19 : vector<2x64x1xf32> to vector<2x64x256xf32>
    %21 = arith.mulf %18, %20 : vector<2x64x256xf32>
    %c0_18 = arith.constant 0 : index
    %c0_19 = arith.constant 0 : index
    %c0_20 = arith.constant 0 : index
    %22 = vector.load %arg4[%c0_18, %c0_19, %c0_20] : memref<2x64x256xf32, #tpu.memory_space<vmem>>, vector<2x64x256xf32>
    tpu.vector_store %arg4[%c0_18, %c0_19, %c0_20], %21 {strides = array<i32>} : memref<2x64x256xf32, #tpu.memory_space<vmem>>, vector<2x64x256xf32>,
    return
  }
  func.func @transform_0(%arg0: i32) -> (i32, i32, i32) {
    %c0_i32 = arith.constant 0 : i32
    %c0_i32_0 = arith.constant 0 : i32
    %c0_i32_1 = arith.constant 0 : i32
    %c0_i32_2 = arith.constant 0 : i32
    return %c0_i32, %c0_i32_0, %c0_i32_1 : i32, i32, i32
  }
  func.func @transform_1(%arg0: i32) -> (i32, i32) {
    %c0_i32 = arith.constant 0 : i32
    %c0_i32_0 = arith.constant 0 : i32
    %c0_i32_1 = arith.constant 0 : i32
    return %c0_i32, %c0_i32_0 : i32, i32
  }
  func.func @transform_2(%arg0: i32) -> (i32, i32) {
    %c0_i32 = arith.constant 0 : i32
    %c0_i32_0 = arith.constant 0 : i32
    %c0_i32_1 = arith.constant 0 : i32
    return %c0_i32, %c0_i32_0 : i32, i32
  }
  func.func @transform_3(%arg0: i32) -> (i32, i32, i32) {
    %c0_i32 = arith.constant 0 : i32
    %c0_i32_0 = arith.constant 0 : i32
    %c0_i32_1 = arith.constant 0 : i32
    %c0_i32_2 = arith.constant 0 : i32
    return %c0_i32, %c0_i32_0, %c0_i32_1 : i32, i32, i32
  }
  func.func @transform_4(%arg0: i32) -> (i32, i32) {
    %c0_i32 = arith.constant 0 : i32
    %c0_i32_0 = arith.constant 0 : i32
    %c0_i32_1 = arith.constant 0 : i32
    return %c0_i32, %c0_i32_0 : i32, i32
  }
}

</mosaic_0001>

<bundles_post_ra>
// kernel: _lambda_.1
= control target key start
LH: loop header
LB: loop body
LE: loop exit
PB: predicated region body
PF: predicated region fallthrough
CT: control target
= control target key end

     0   :  { %s1047_s0 = inlined_call_operand.vmem [shape: f32[2,64,256], index: 0, kind: input, shape index: {}]   ;;  %s1048_s1 = inlined_call_operand.vmem [shape: f32[64,4], index: 1, kind: input, shape index: {}]   ;;  %s1049_s2 = inlined_call_operand.vmem [shape: f32[4,64], index: 2, kind: input, shape index: {}]   ;;  %s1050_s3 = inlined_call_operand.vmem [shape: f32[2,64,256], index: 3, kind: output, shape index: {0}]   ;;  %s1051_s4 = inlined_call_operand.hbm [shape: f32[2,64], index: 4, kind: output, shape index: {1}]  }
   0x1   :  { %v676_v0 = vld [vmem:[%s1047_s0 + $0x80] sm:$0xff]  ;;  %v681_v1 = vld [vmem:[%s1047_s0 + $0x88] sm:$0xff]  ;;  %v698_v5 = vld [vmem:[%s1047_s0 + $0x90] sm:$0xff] }
   0x2   :  { %v686_v2 = vld [vmem:[%s1047_s0] sm:$0xff]  ;;  %v73_v3 = vadd.f32 %v681_v1, %v676_v0  ;;  %v693_v4 = vld [vmem:[%s1047_s0 + $0x8] sm:$0xff]  ;;  %v703_v6 = vld [vmem:[%s1047_s0 + $0x98] sm:$0xff] }
   0x3   :  { %v49_v7 = vadd.f32 %v693_v4, %v686_v2  ;;  %v710_v8 = vld [vmem:[%s1047_s0 + $0x10] sm:$0xff]  ;;  %v715_v9 = vld [vmem:[%s1047_s0 + $0x18] sm:$0xff]  ;;  %v76_v10 = vadd.f32 %v703_v6, %v698_v5  ;;  %v724_v12 = vld [vmem:[%s1047_s0 + $0xa0] sm:$0xff] }
   0x4   :  { %74 = vadd.xlane.f32.xlu1 %v73_v3  ;;  %v52_v11 = vadd.f32 %v715_v9, %v710_v8  ;;  %v729_v13 = vld [vmem:[%s1047_s0 + $0xa8] sm:$0xff]  ;;  %v734_v14 = vld [vmem:[%s1047_s0 + $0x20] sm:$0xff]  ;;  %v748_v18 = vld [vmem:[%s1047_s0 + $0xb0] sm:$0xff] }
   0x5   :  { %50 = vadd.xlane.f32.xlu0 %v49_v7  ;;  %v739_v15 = vld [vmem:[%s1047_s0 + $0x28] sm:$0xff]  ;;  %v79_v16 = vadd.f32 %v729_v13, %v724_v12  ;;  %v753_v19 = vld [vmem:[%s1047_s0 + $0xb8] sm:$0xff]  ;;  %v758_v20 = vld [vmem:[%s1047_s0 + $0x30] sm:$0xff] }
   0x6   :  { %v55_v17 = vadd.f32 %v739_v15, %v734_v14  ;;  %1059 = vst [vmem:[#allocation5_spill] sm:$0xff] %v753_v19  ;;  %v763_v21 = vld [vmem:[%s1047_s0 + $0x38] sm:$0xff] }
   0x8   :  { %77 = vadd.xlane.f32.xlu1 %v76_v10 }
   0x9   :  { %53 = vadd.xlane.f32.xlu0 %v52_v11 }
   0xa   :  { %10 = vsyncpa [#allocation3], 0  ;;  %v82_v22 = vadd.f32 %v753_v19, %v748_v18  ;;  %v58_v23 = vadd.f32 %v763_v21, %v758_v20  ;;  %v772_v24 = vld [vmem:[%s1047_s0 + $0xc0] sm:$0xff]  ;;  %v777_v25 = vld [vmem:[%s1047_s0 + $0xc8] sm:$0xff]  ;;  %v645_v48 = vmov 0.0   ;;  %vm646_vm0 = vmmov 0  }
   0xb   :  { %v782_v26 = vld [vmem:[%s1047_s0 + $0x40] sm:$0xff]  ;;  %v787_v27 = vld [vmem:[%s1047_s0 + $0x48] sm:$0xff]  ;;  %v85_v28 = vadd.f32 %v777_v25, %v772_v24  ;;  %v796_v30 = vld [vmem:[%s1047_s0 + $0xd0] sm:$0xff]  ;;  %592 = vmatprep.subr.mxu0 %v645_v48  ;;  %611 = vmatprep.subr.mxu1 %v645_v48  ;;  %v137_v61 = vlaneseq  ;;  %vm148_vm1 = vcmask 130112   ;;  %vm155_vm2 = vcmask 195712  }
   0xc   :  { %80 = vadd.xlane.f32.xlu1 %v79_v16  ;;  %v61_v29 = vadd.f32 %v787_v27, %v782_v26  ;;  %1060 = vst [vmem:[#allocation6_spill] sm:$0xff] %v796_v30  ;;  %v801_v31 = vld [vmem:[%s1047_s0 + $0xd8] sm:$0xff]  ;;  %v806_v32 = vld [vmem:[%s1047_s0 + $0x50] sm:$0xff]  ;;  %v820_v36 = vld [vmem:[%s1047_s0 + $0xe0] sm:$0xff]  ;;  %608 = vmatprep.mubr.msk.f32.mxu0 %vm646_vm0, %v645_v48  ;;  %vm162_vm3 = vcmask 261312   ;;  %vm169_vm4 = vcmask 326912  }
   0xd   :  { %56 = vadd.xlane.f32.xlu0 %v55_v17  ;;  %1061 = vst [vmem:[#allocation7_spill] sm:$0xff] %v801_v31  ;;  %v811_v33 = vld [vmem:[%s1047_s0 + $0x58] sm:$0xff]  ;;  %v88_v34 = vadd.f32 %v801_v31, %v796_v30  ;;  %1062 = vst [vmem:[#allocation8_spill] sm:$0xff] %v820_v36  ;;  %v825_v37 = vld [vmem:[%s1047_s0 + $0xe8] sm:$0xff]  ;;  %613 = vmatprep.mubr.msk.f32.mxu1 %vm646_vm0, %v645_v48  ;;  %v138_v3 = vand.u32 127, %v137_v61  ;;  %v889_v10 = vshrl.u32 %v137_v61, 7 }
   0xe   :  { %v64_v35 = vadd.f32 %v811_v33, %v806_v32  ;;  %1063 = vst [vmem:[#allocation9_spill] sm:$0xff] %v825_v37  ;;  %v830_v38 = vld [vmem:[%s1047_s0 + $0x60] sm:$0xff]  ;;  %v835_v39 = vld [vmem:[%s1047_s0 + $0x68] sm:$0xff]  ;;  %v91_v40 = vadd.f32 %v825_v37, %v820_v36  ;;  %v844_v42 = vld [vmem:[%s1047_s0 + $0xf0] sm:$0xff]  ;;  %vm176_vm5 = vcmask 392512   ;;  %vm183_vm6 = vcmask 458112  }
   0xf   :  { %v67_v41 = vadd.f32 %v835_v39, %v830_v38  ;;  %1064 = vst [vmem:[#allocation10_spill] sm:$0xff] %v844_v42  ;;  %v849_v43 = vld [vmem:[%s1047_s0 + $0xf8] sm:$0xff]  ;;  %v854_v44 = vld [vmem:[%s1047_s0 + $0x70] sm:$0xff]  ;;  %v118_v51 = vld [vmem:[%s1048_s1 + $0x28] sm:$0xff]  ;;  %v143_v16 = vadd.s32 4294967288, %v138_v3  ;;  %v150_v17 = vadd.s32 4294967280, %v138_v3 }
  0x10   :  { %83 = vadd.xlane.f32.xlu1 %v82_v22  ;;  %1065 = vst [vmem:[#allocation11_spill] sm:$0xff] %v849_v43  ;;  %v859_v45 = vld [vmem:[%s1047_s0 + $0x78] sm:$0xff]  ;;  %v94_v46 = vadd.f32 %v849_v43, %v844_v42  ;;  %v119_v50 = vld [vmem:[%s1048_s1 + $0x30] sm:$0xff]  ;;  %v117_v52 = vld [vmem:[%s1048_s1 + $0x20] sm:$0xff]  ;;  %v157_v22 = vadd.s32 4294967272, %v138_v3  ;;  %vm190_vm7 = vcmask 523712  }
  0x11   :  { %59 = vadd.xlane.f32.xlu0 %v58_v23  ;;  %v70_v47 = vadd.f32 %v859_v45, %v854_v44  ;;  %v120_v49 = vld [vmem:[%s1048_s1 + $0x38] sm:$0xff]  ;;  %v115_v54 = vld [vmem:[%s1048_s1 + $0x10] sm:$0xff]  ;;  %v114_v55 = vld [vmem:[%s1048_s1 + $0x8] sm:$0xff]  ;;  %v164_v23 = vadd.s32 4294967264, %v138_v3  ;;  %vm231_vm8 = vcmask 1041409   ;;  %vm233_vm9 = vcmask 523264  }
  0x12   :  { %593 = vmatpush3.msra.mxu0 %v120_v49  ;;  %v116_v53 = vld [vmem:[%s1048_s1 + $0x18] sm:$0xff]  ;;  %v113_v56 = vld [vmem:[%s1048_s1] sm:$0xff]  ;;  %vm312_vm10 = vcmask 1043456   ;;  %vm308_vm11 = vcmask 31744   ;;  %vm392_vm12 = vcmask 517120  }
  0x13   :  { %594 = vmatprep.subr.mxu0 %v645_v48  ;;  %v167_v49 = vsub.s32 %v164_v23, %v889_v10  ;;  %v185_v23 = vadd.s32 4294967240, %v138_v3 }
  0x14   :  { %86 = vadd.xlane.f32.xlu1 %v85_v28  ;;  %595 = vmatpush3.msra.mxu0 %v119_v50 }
  0x15   :  { %62 = vadd.xlane.f32.xlu0 %v61_v29  ;;  %596 = vmatprep.subr.mxu0 %v645_v48  ;;  %v171_v29 = vadd.s32 4294967256, %v138_v3 }
  0x16   :  { %597 = vmatpush3.msra.mxu0 %v118_v51 }
  0x17   :  { %598 = vmatprep.subr.mxu0 %v645_v48 }
  0x18   :  { %89 = vadd.xlane.f32.xlu1 %v88_v34  ;;  %599 = vmatpush3.msra.mxu0 %v117_v52  ;;  %v141_v34 = vsub.s32 %v138_v3, %v889_v10  ;;  %v174_v52 = vsub.s32 %v171_v29, %v889_v10 }
  0x19   :  { %65 = vadd.xlane.f32.xlu0 %v64_v35  ;;  %600 = vmatprep.subr.mxu0 %v645_v48 }
  0x1a   :  { %601 = vmatpush3.msra.mxu0 %v116_v53 }
  0x1b   :  { %602 = vmatprep.subr.mxu0 %v645_v48 }
  0x1c   :  { %92 = vadd.xlane.f32.xlu1 %v91_v40  ;;  %603 = vmatpush3.msra.mxu0 %v115_v54  ;;  %v146_v40 = vsub.s32 %v143_v16, %v889_v10 }
  0x1d   :  { %68 = vadd.xlane.f32.xlu0 %v67_v41  ;;  %604 = vmatprep.subr.mxu0 %v645_v48  ;;  %v153_v41 = vsub.s32 %v150_v17, %v889_v10 }
  0x1e   :  { %605 = vmatpush3.msra.mxu0 %v114_v55 }
  0x1f   :  { %606 = vmatprep.subr.mxu0 %v645_v48  ;;  %v160_v48 = vsub.s32 %v157_v22, %v889_v10 }
  0x20   :  { %95 = vadd.xlane.f32.xlu1 %v94_v46  ;;  %607 = vmatpush3.msra.mxu0 %v113_v56  ;;  %v178_v46 = vadd.s32 4294967248, %v138_v3  ;;  %v188_v3 = vsub.s32 %v185_v23, %v889_v10 }
  0x21   :  { %71 = vadd.xlane.f32.xlu0 %v70_v47 }
  0x8d   :  { %v75_v57 = vpop.xlane.xlu1 %74 }
  0x8e   :  { %v51_v58 = vpop.xlane.xlu0 %50  ;;  %v105_v54 = vmul.f32 0.00390625, %v75_v57 }
  0x8f   :  { %v97_v16 = vmul.f32 0.00390625, %v51_v58 }
  0x90   :  { %v195_v37 = vrot.slane %v105_v54, %v141_v34 }
  0x91   :  { %v78_v59 = vpop.xlane.xlu1 %77  ;;  %v142_v19 = vrot.slane %v97_v16, %v141_v34 }
  0x92   :  { %v54_v60 = vpop.xlane.xlu0 %53  ;;  %v106_v47 = vmul.f32 0.00390625, %v78_v59  ;;  %v181_v59 = vsub.s32 %v178_v46, %v889_v10 }
  0x93   :  { %v98_v50 = vmul.f32 0.00390625, %v54_v60 }
  0x94   :  { %v199_v22 = vrot.slane %v106_v47, %v146_v40 }
  0x95   :  { %v81_v62 = vpop.xlane.xlu1 %80  ;;  %v147_v60 = vrot.slane %v98_v50, %v146_v40 }
  0x96   :  { %v57_v63 = vpop.xlane.xlu0 %56  ;;  %v107_v51 = vmul.f32 0.00390625, %v81_v62  ;;  %v200_v46 = vsel %vm148_vm1, %v199_v22, %v195_v37  ;;  %v307_v22 = vld [vmem:[%s1049_s2] sm:$0xf]  ;;  %s647_s2 = smov [#allocation2]  }
  0x97   :  { %v99_v55 = vmul.f32 0.00390625, %v57_v63  ;;  %v149_v40 = vsel %vm148_vm1, %v147_v60, %v142_v19  ;;  %612 = vmatpush3.msk.msra.mxu1 %vm312_vm10, %v307_v22  ;;  %s568_s17 = sshll.u32 %s647_s2, 4  ;;  %s569_s17 = int_to_ptr.vmem [resolvable:$true] %s568_s17 }
  0x98   :  { %v204_v62 = vrot.slane %v107_v51, %v153_v41  ;;  %s623_s18 = scalar_lea.vmem %s569_s17, 32  ;;  %p628_p1 = scmp.lt.s32.totalorder %s569_s17, %s569_s17 }
  0x99   :  { %v84_v7 = vpop.xlane.xlu1 %83  ;;  %v154_v57 = vrot.slane %v99_v55, %v153_v41  ;;  %p624_p0 = scmp.ne.s32.totalorder %s569_s17, %s623_s18  ;;  %p629_p2 = scmp.lt.s32.totalorder %s623_s18, %s623_s18 }
  0x9a   :  { %v60_v11 = vpop.xlane.xlu0 %59  ;;  %v108_v56 = vmul.f32 0.00390625, %v84_v7  ;;  %v205_v50 = vsel %vm155_vm2, %v204_v62, %v200_v46 }
  0x9b   :  { %v100_v17 = vmul.f32 0.00390625, %v60_v11  ;;  %v156_v54 = vsel %vm155_vm2, %v154_v57, %v149_v40  ;;  %p630_p3 = por %p629_p2, %p628_p1 }
  0x9c   :  { %v209_v63 = vrot.slane %v108_v56, %v160_v48 }
  0x9d   :  { %v87_v28 = vpop.xlane.xlu1 %86  ;;  %v161_v58 = vrot.slane %v100_v17, %v160_v48  ;;  %p631_p4 = pnand %p630_p3, %p624_p0 }
  0x9e   :  { %v63_v35 = vpop.xlane.xlu0 %62  ;;  %v109_v43 = vmul.f32 0.00390625, %v87_v28  ;;  %v210_v34 = vsel %vm162_vm3, %v209_v63, %v205_v50 }
  0x9f   :  { %v101_v42 = vmul.f32 0.00390625, %v63_v35  ;;  %v163_v37 = vsel %vm162_vm3, %v161_v58, %v156_v54 }
  0xa0   :  { %v214_v11 = vrot.slane %v109_v43, %v167_v49 }
  0xa1   :  { %v90_v53 = vpop.xlane.xlu1 %89  ;;  %v168_v47 = vrot.slane %v101_v42, %v167_v49 }
  0xa2   :  { %v66_v61 = vpop.xlane.xlu0 %65  ;;  %v110_v31 = vmul.f32 0.00390625, %v90_v53 }
  0xa3   :  { %v102_v30 = vmul.f32 0.00390625, %v66_v61  ;;  %v170_v19 = vsel %vm169_vm4, %v168_v47, %v163_v37 }
  0xa4   :  { %v219_v35 = vrot.slane %v110_v31, %v174_v52  ;;  %v215_v31 = vsel %vm169_vm4, %v214_v11, %v210_v34 }
  0xa5   :  { %v93_v29 = vpop.xlane.xlu1 %92  ;;  %v175_v51 = vrot.slane %v102_v30, %v174_v52 }
  0xa6   :  { %v111_v7 = vmul.f32 0.00390625, %v93_v29  ;;  %v69_v36 = vpop.xlane.xlu0 %68  ;;  %v220_v49 = vsel %vm176_vm5, %v219_v35, %v215_v31  ;;  %v463_v35 = vsub.s32 1, %v889_v10 }
  0xa7   :  { %v103_v28 = vmul.f32 0.00390625, %v69_v36  ;;  %v177_v52 = vsel %vm176_vm5, %v175_v51, %v170_v19 }
  0xa8   :  { %v224_v53 = vrot.slane %v111_v7, %v181_v59 }
  0xa9   :  { %v96_v41 = vpop.xlane.xlu1 %95  ;;  %v182_v48 = vrot.slane %v103_v28, %v181_v59  ;;  %v428_v28 = vsub.s32 0, %v889_v10 }
  0xaa   :  { %v112_v43 = vmul.f32 0.00390625, %v96_v41  ;;  %v72_v36 = vpop.xlane.xlu0 %71  ;;  %v225_v55 = vsel %vm183_vm6, %v224_v53, %v220_v49 }
  0xab   :  { %v104_v42 = vmul.f32 0.00390625, %v72_v36  ;;  %v184_v61 = vsel %vm183_vm6, %v182_v48, %v177_v52 }
  0xac   :  { %v229_v30 = vrot.slane %v112_v43, %v188_v3 }
  0xad   :  { %v189_v56 = vrot.slane %v104_v42, %v188_v3 }
  0xae   :  { %v230_v16 = vsel %vm190_vm7, %v229_v30, %v225_v55 }
  0xaf   :  { %v191_v17 = vsel %vm190_vm7, %v189_v56, %v184_v61 }
  0xb0   :  { %v232_v59 = vsel %vm231_vm8, %v230_v16, %v191_v17 }
  0xb1   :  { %609 = vmatmul.mubr.msk.f32.vlgmr.msra.gmra.mxu0 %vm233_vm9, %v232_v59 }
 0x171   :  { %v302_v23 = vpop.f32.mrf.mxu0 }
 0x172   :  { %v306_v60 = vmax.f32 %v302_v23, 0.0 }
 0x173   :  { %v610_v62 = vpop.f32.mrf.mxu0 }
 0x174   :  { %614 = vmatmul.mubr.msk.f32.vlgmr.msra.gmra.mxu1 %vm308_vm11, %v306_v60 }
 0x234   :  { %v382_v29 = vpop.f32.mrf.mxu1 }
 0x235   :  { %v386_v57 = vsub.f32 0.0, %v382_v29 }
 0x236   :  { %v615_v63 = vpop.f32.mrf.mxu1 }
 0x237   :  { %v387_v7 = vmul.f32 1.442695, %v386_v57 }
 0x239   :  { %619 = vpow2.f32 %v387_v7 }
 0x246   :  { %v620_v58 = vpop.eup %619 }
 0x247   :  { %v389_v11 = vadd.f32 1.0, %v620_v58 }
 0x249   :  { %621 = vrcp.f32 %v389_v11 }
 0x256   :  { %v622_v46 = vpop.eup %621 }
 0x257   :  { %v429_v47 = vrot.slane %v622_v46, %v428_v28  ;;  %393 = vst.msk [vmem:[#allocation2] sm:$0x3] %vm392_vm12, %v622_v46  ;;  %v464_v3 = vrot.slane %v622_v46, %v463_v35 }
 0x259   :  { %435 = vbcast.lane.b32.xlu1 %v429_v47, 264  ;;  %431 = vbcast.lane.b32.xlu0 %v429_v47, 256 }
 0x25d   :  { %439 = vbcast.lane.b32.xlu1 %v429_v47, 272  ;;  %447 = vbcast.lane.b32.xlu0 %v429_v47, 288 }
 0x261   :  { %443 = vbcast.lane.b32.xlu1 %v429_v47, 280  ;;  %455 = vbcast.lane.b32.xlu0 %v429_v47, 304 }
 0x265   :  { %451 = vbcast.lane.b32.xlu1 %v429_v47, 296  ;;  %466 = vbcast.lane.b32.xlu0 %v464_v3, 256 }
 0x269   :  { %459 = vbcast.lane.b32.xlu1 %v429_v47, 312  ;;  %474 = vbcast.lane.b32.xlu0 %v464_v3, 272 }
 0x26d   :  { %470 = vbcast.lane.b32.xlu1 %v464_v3, 264  ;;  %482 = vbcast.lane.b32.xlu0 %v464_v3, 288 }
 0x26e   :  { %634 = shalt.err (!%p631_p4)
}
 0x26f   :  { %571 = dma.vmem_to_hbm [thread:$0]  %s569_s17, 32, %s1051_s4, [#allocation3]   ;;  %v1067_v52 = vld [vmem:[#allocation8_spill] sm:$0xff]  ;;  %v1068_v56 = vld [vmem:[#allocation9_spill] sm:$0xff]  ;;  %v1069_v16 = vld [vmem:[#allocation6_spill] sm:$0xff] }
 0x270   :  { %v1070_v59 = vld [vmem:[#allocation7_spill] sm:$0xff]  ;;  %v1071_v60 = vld [vmem:[#allocation10_spill] sm:$0xff] }
 0x271   :  { %478 = vbcast.lane.b32.xlu1 %v464_v3, 280  ;;  %490 = vbcast.lane.b32.xlu0 %v464_v3, 304  ;;  %v1072_v29 = vld [vmem:[#allocation11_spill] sm:$0xff] }
 0x275   :  { %486 = vbcast.lane.b32.xlu1 %v464_v3, 296 }
 0x279   :  { %494 = vbcast.lane.b32.xlu1 %v464_v3, 312 }
 0x2cb   :  { %v436_v10 = vpop.permute.xlu1 %435  ;;  %v432_v40 = vpop.permute.xlu0 %431 }
 0x2cc   :  { %v498_v50 = vmul.f32 %v436_v10, %v710_v8  ;;  %v499_v51 = vmul.f32 %v436_v10, %v715_v9  ;;  %v496_v53 = vmul.f32 %v432_v40, %v686_v2  ;;  %v497_v41 = vmul.f32 %v432_v40, %v693_v4 }
 0x2ce   :  { %530 = vst [vmem:[%s1050_s3 + $0x10] sm:$0xff] %v498_v50  ;;  %531 = vst [vmem:[%s1050_s3 + $0x18] sm:$0xff] %v499_v51 }
 0x2cf   :  { %528 = vst [vmem:[%s1050_s3] sm:$0xff] %v496_v53  ;;  %529 = vst [vmem:[%s1050_s3 + $0x8] sm:$0xff] %v497_v41  ;;  %v440_v8 = vpop.permute.xlu1 %439  ;;  %v448_v2 = vpop.permute.xlu0 %447 }
 0x2d0   :  { %v500_v4 = vmul.f32 %v440_v8, %v734_v14  ;;  %v501_v9 = vmul.f32 %v440_v8, %v739_v15  ;;  %v504_v54 = vmul.f32 %v448_v2, %v782_v26  ;;  %v505_v34 = vmul.f32 %v448_v2, %v787_v27 }
 0x2d2   :  { %532 = vst [vmem:[%s1050_s3 + $0x20] sm:$0xff] %v500_v4  ;;  %533 = vst [vmem:[%s1050_s3 + $0x28] sm:$0xff] %v501_v9 }
 0x2d3   :  { %536 = vst [vmem:[%s1050_s3 + $0x40] sm:$0xff] %v504_v54  ;;  %537 = vst [vmem:[%s1050_s3 + $0x48] sm:$0xff] %v505_v34  ;;  %v444_v14 = vpop.permute.xlu1 %443  ;;  %v456_v15 = vpop.permute.xlu0 %455 }
 0x2d4   :  { %v502_v26 = vmul.f32 %v444_v14, %v758_v20  ;;  %v503_v27 = vmul.f32 %v444_v14, %v763_v21  ;;  %v508_v48 = vmul.f32 %v456_v15, %v830_v38  ;;  %v509_v43 = vmul.f32 %v456_v15, %v835_v39 }
 0x2d6   :  { %534 = vst [vmem:[%s1050_s3 + $0x30] sm:$0xff] %v502_v26  ;;  %535 = vst [vmem:[%s1050_s3 + $0x38] sm:$0xff] %v503_v27 }
 0x2d7   :  { %540 = vst [vmem:[%s1050_s3 + $0x60] sm:$0xff] %v508_v48  ;;  %541 = vst [vmem:[%s1050_s3 + $0x68] sm:$0xff] %v509_v43  ;;  %v452_v20 = vpop.permute.xlu1 %451  ;;  %v467_v21 = vpop.permute.xlu0 %466 }
 0x2d8   :  { %v506_v38 = vmul.f32 %v452_v20, %v806_v32  ;;  %v507_v39 = vmul.f32 %v452_v20, %v811_v33  ;;  %v512_v36 = vmul.f32 %v467_v21, %v676_v0  ;;  %v513_v37 = vmul.f32 %v467_v21, %v681_v1 }
 0x2da   :  { %538 = vst [vmem:[%s1050_s3 + $0x50] sm:$0xff] %v506_v38  ;;  %539 = vst [vmem:[%s1050_s3 + $0x58] sm:$0xff] %v507_v39 }
 0x2db   :  { %544 = vst [vmem:[%s1050_s3 + $0x80] sm:$0xff] %v512_v36  ;;  %545 = vst [vmem:[%s1050_s3 + $0x88] sm:$0xff] %v513_v37  ;;  %v460_v32 = vpop.permute.xlu1 %459  ;;  %v475_v0 = vpop.permute.xlu0 %474 }
 0x2dc   :  { %v510_v1 = vmul.f32 %v460_v32, %v854_v44  ;;  %v511_v33 = vmul.f32 %v460_v32, %v859_v45  ;;  %v516_v31 = vmul.f32 %v475_v0, %v724_v12  ;;  %v517_v42 = vmul.f32 %v475_v0, %v729_v13 }
 0x2de   :  { %542 = vst [vmem:[%s1050_s3 + $0x70] sm:$0xff] %v510_v1  ;;  %543 = vst [vmem:[%s1050_s3 + $0x78] sm:$0xff] %v511_v33 }
 0x2df   :  { %548 = vst [vmem:[%s1050_s3 + $0xa0] sm:$0xff] %v516_v31  ;;  %549 = vst [vmem:[%s1050_s3 + $0xa8] sm:$0xff] %v517_v42  ;;  %v471_v44 = vpop.permute.xlu1 %470  ;;  %v483_v12 = vpop.permute.xlu0 %482 }
 0x2e0   :  { %v514_v13 = vmul.f32 %v471_v44, %v698_v5  ;;  %v515_v45 = vmul.f32 %v471_v44, %v703_v6  ;;  %v520_v19 = vmul.f32 %v483_v12, %v772_v24  ;;  %v521_v49 = vmul.f32 %v483_v12, %v777_v25  ;;  %v1066_v25 = vld [vmem:[#allocation5_spill] sm:$0xff] }
 0x2e2   :  { %546 = vst [vmem:[%s1050_s3 + $0x90] sm:$0xff] %v514_v13  ;;  %547 = vst [vmem:[%s1050_s3 + $0x98] sm:$0xff] %v515_v45 }
 0x2e3   :  { %552 = vst [vmem:[%s1050_s3 + $0xc0] sm:$0xff] %v520_v19  ;;  %553 = vst [vmem:[%s1050_s3 + $0xc8] sm:$0xff] %v521_v49  ;;  %v479_v5 = vpop.permute.xlu1 %478  ;;  %v491_v6 = vpop.permute.xlu0 %490 }
 0x2e4   :  { %v518_v24 = vmul.f32 %v479_v5, %v748_v18  ;;  %v519_v30 = vmul.f32 %v479_v5, %v1066_v25  ;;  %v524_v55 = vmul.f32 %v491_v6, %v1067_v52  ;;  %v525_v61 = vmul.f32 %v491_v6, %v1068_v56 }
 0x2e6   :  { %550 = vst [vmem:[%s1050_s3 + $0xb0] sm:$0xff] %v518_v24  ;;  %551 = vst [vmem:[%s1050_s3 + $0xb8] sm:$0xff] %v519_v30 }
 0x2e7   :  { %556 = vst [vmem:[%s1050_s3 + $0xe0] sm:$0xff] %v524_v55  ;;  %557 = vst [vmem:[%s1050_s3 + $0xe8] sm:$0xff] %v525_v61  ;;  %v487_v18 = vpop.permute.xlu1 %486 }
 0x2e8   :  { %v522_v17 = vmul.f32 %v487_v18, %v1069_v16  ;;  %v523_v22 = vmul.f32 %v487_v18, %v1070_v59 }
 0x2ea   :  { %554 = vst [vmem:[%s1050_s3 + $0xd0] sm:$0xff] %v522_v17  ;;  %555 = vst [vmem:[%s1050_s3 + $0xd8] sm:$0xff] %v523_v22 }
 0x2eb   :  { %v495_v23 = vpop.permute.xlu1 %494 }
 0x2ec   :  { %v526_v62 = vmul.f32 %v495_v23, %v1071_v60  ;;  %v527_v57 = vmul.f32 %v495_v23, %v1072_v29 }
 0x2ee   :  { %558 = vst [vmem:[%s1050_s3 + $0xf0] sm:$0xff] %v526_v62  ;;  %559 = vst [vmem:[%s1050_s3 + $0xf8] sm:$0xff] %v527_v57 }
 0x2ef   :  { %643 = dma.done.wait [#allocation3], 32  }
 0x2f0   :  { %644 = vsyncadd [#allocation3], 4294967264 }
 0x2f1   :  { %577 = vsyncpa [#allocation3], 1 }

</bundles_post_ra>
